<compile_context>
chip_gen: v6e
topology: v6e:2x2x1
jax: 0.10.0
libtpu: 0.0.40
codegen_flags: <defaults>
</compile_context>

<pallas_src>
import jax
import jax.numpy as jnp
from jax.experimental import pallas as pl
from jax.experimental.pallas import tpu as pltpu

INV_TEMPERATURE = 1.0e6  # module computes sim / 1e-06


def _similarity_loss_kernel(a_ref, p_ref, o_ref):
    i = pl.program_id(0)

    @pl.when(i == 0)
    def _init():
        o_ref[...] = jnp.zeros_like(o_ref)

    # Native-dtype tiles straight to the MXU; temperature folded into the LHS
    # (bm*D multiplies instead of bm*N on the matmul result).
    a = a_ref[...] * jnp.asarray(INV_TEMPERATURE, dtype=a_ref.dtype)   # (bm, D)
    p = p_ref[...]                                                     # (N,  D)

    # sim = (anchor / T) @ positives.T without materializing p.T (contract dim 1 of both).
    sim = jax.lax.dot_general(
        a, p,
        dimension_numbers=(((1,), (1,)), ((), ())),
        preferred_element_type=jnp.float32)                            # (bm, N) f32

    # Numerically stable row softmax.  Denominator reciprocal on the EUP slot
    # (approx) + one Newton-Raphson refinement on the VPU for ~exact f32.
    m = jnp.max(sim, axis=-1, keepdims=True)
    e = jnp.exp(sim - m)
    denom = jnp.sum(e, axis=-1, keepdims=True)
    inv = pl.reciprocal(denom, approx=True)
    inv = inv * (2.0 - denom * inv)                                    # Newton step
    prob = e * inv                                                     # (bm, N)

    # cross_entropy(prob, arange(N)) with prob treated as logits:
    #   loss_i = logsumexp_j(prob[i, j]) - prob[i, i]
    # prob is in [0, 1] so exp(prob) <= e: no second max-subtraction pass needed.
    lse = jnp.log(jnp.sum(jnp.exp(prob), axis=-1, keepdims=True))      # (bm, 1)

    # Diagonal prob[i, i] extracted from the same matmul-derived prob matrix
    # (algebraic recompute is unsafe under the 1e6 temperature amplification).
    bm, n = prob.shape
    grow = jax.lax.broadcasted_iota(jnp.int32, (bm, n), 0) + i * bm    # global row index
    gcol = jax.lax.broadcasted_iota(jnp.int32, (bm, n), 1)             # global col index
    diag = jnp.sum(jnp.where(grow == gcol, prob, 0.0),
                   axis=-1, keepdims=True)                             # (bm, 1)

    # Accumulate this row block's raw contribution; the 1/N mean is applied once
    # in the wrapper (no per-block scalar multiply).
    o_ref[...] += jnp.sum(lse - diag, keepdims=True)


def _pick_block_rows(n, preferred=256):
    # MXU-friendly row block (256 on v6e/v7x, still fine on v5e); fall back to a
    # single resident block if n has no convenient divisor.
    for bm in (preferred, 512, 256, 128, 64, 32, 16, 8):
        if n % bm == 0:
            return bm
    return n


def similarity_loss(anchor, positives, *, block_rows=256):
    """anchor: (N, D), positives: (N, D) -> scalar float32 loss."""
    n, d = anchor.shape
    assert positives.shape == (n, d)
    bm = _pick_block_rows(n, block_rows)

    out = pl.pallas_call(
        _similarity_loss_kernel,
        out_shape=jax.ShapeDtypeStruct((1, 1), jnp.float32),
        grid_spec=pltpu.PrefetchScalarGridSpec(
            num_scalar_prefetch=0,
            grid=(n // bm,),
            in_specs=[
                pl.BlockSpec((bm, d), lambda i: (i, 0)),   # anchor row block
                pl.BlockSpec((n, d), lambda i: (0, 0)),    # full positives resident
            ],
            out_specs=pl.BlockSpec((1, 1), lambda i: (0, 0)),  # scalar accumulator
        ),
        compiler_params=pltpu.CompilerParams(
            # row axis is a reduction into the (1,1) output -> arbitrary
            dimension_semantics=("arbitrary",)),
    )(anchor, positives)
    return out[0, 0] * (1.0 / n)


def _reference_loss(anchor, positives):
    sim = jax.lax.dot_general(
        anchor, positives,
        dimension_numbers=(((1,), (1,)), ((), ())),
        precision=jax.lax.Precision.HIGHEST,
        preferred_element_type=jnp.float32)
    prob = jax.nn.softmax(sim / 1e-6, axis=-1)
    n = anchor.shape[0]
    # cross entropy with prob as logits, labels = arange(n), mean reduction
    logz = jax.nn.logsumexp(prob, axis=-1)
    picked = prob[jnp.arange(n), jnp.arange(n)]
    return jnp.mean(logz - picked)


if __name__ == "__main__":
    key = jax.random.PRNGKey(0)
    k1, k2 = jax.random.split(key)
    N, D = 8, 32
    anchor = jax.random.normal(k1, (N, D), dtype=jnp.float32)
    # Positives correlated with the anchors (as in real contrastive use) so the softmax
    # argmax is unambiguous under the extreme 1e6 inverse temperature.
    positives = anchor + 0.05 * jax.random.normal(k2, (N, D), dtype=jnp.float32)

    loss = similarity_loss(anchor, positives)
    jax.block_until_ready(loss)

    ref = _reference_loss(anchor, positives)
    assert jnp.allclose(loss, ref, atol=1e-4, rtol=1e-4), (loss, ref)
    print("KERNEL_OK")
</pallas_src>

<mosaic_0001>
module attributes {stable_mosaic.version = 11 : i64} {
  func.func @_similarity_loss_kernel(%arg0: i32, %arg1: memref<8x32xf32, #tpu.memory_space<vmem>>, %arg2: memref<8x32xf32, #tpu.memory_space<vmem>>, %arg3: memref<1x1xf32, #tpu.memory_space<vmem>>) attributes {dimension_semantics = [#tpu.dimension_semantics<arbitrary>], iteration_bounds = array<i64: 1>, scalar_prefetch = 0 : i64, scratch_operands = 0 : i64, tpu.core_type = #tpu.core_type<tc>, window_params = [{transform_indices = @transform_0, window_bounds = array<i64: 8, 32>}, {pipeline_mode = #tpu.pipeline_mode<synchronous>, transform_indices = @transform_1, window_bounds = array<i64: 8, 32>}, {pipeline_mode = #tpu.pipeline_mode<synchronous>, transform_indices = @transform_2, window_bounds = array<i64: 1, 1>}]} {
    %c0_i32 = arith.constant 0 : i32
    %0 = arith.cmpi eq, %arg0, %c0_i32 : i32
    %1 = arith.extui %0 : i1 to i32
    %c0_i32_0 = arith.constant 0 : i32
    %2 = arith.cmpi ne, %1, %c0_i32_0 : i32
    scf.if %2 {
      %cst_16 = arith.constant 0.000000e+00 : f32
      %45 = vector.broadcast %cst_16 : f32 to vector<1x1xf32>
      %c0_17 = arith.constant 0 : index
      %c0_18 = arith.constant 0 : index
      %46 = vector.load %arg3[%c0_17, %c0_18] : memref<1x1xf32, #tpu.memory_space<vmem>>, vector<1x1xf32>
      tpu.vector_store %arg3[%c0_17, %c0_18], %45 {strides = array<i32>} : memref<1x1xf32, #tpu.memory_space<vmem>>, vector<1x1xf32>,
    } else {
    }
    %c0 = arith.constant 0 : index
    %c0_1 = arith.constant 0 : index
    %3 = vector.load %arg1[%c0, %c0_1] : memref<8x32xf32, #tpu.memory_space<vmem>>, vector<8x32xf32>
    %cst = arith.constant 1.000000e+06 : f32
    %4 = vector.broadcast %cst : f32 to vector<8x32xf32>
    %5 = arith.mulf %3, %4 : vector<8x32xf32>
    %c0_2 = arith.constant 0 : index
    %c0_3 = arith.constant 0 : index
    %6 = vector.load %arg2[%c0_2, %c0_3] : memref<8x32xf32, #tpu.memory_space<vmem>>, vector<8x32xf32>
    %cst_4 = arith.constant dense<0.000000e+00> : vector<8x8xf32>
    %7 = tpu.matmul %5, %6, %cst_4 {dimension_numbers = #tpu.dot_dimension_numbers<[1], [1], [0], [0], [0, 0, 1, 0], [], []>} : vector<8x32xf32>, vector<8x32xf32>, vector<8x8xf32> -> vector<8x8xf32>
    %cst_5 = arith.constant dense<0xFF800000> : vector<8xf32>
    %8 = vector.multi_reduction <maximumf>, %7, %cst_5 [1] : vector<8x8xf32> to vector<8xf32>
    %9 = vector.shape_cast %8 : vector<8xf32> to vector<8x1xf32>
    %10 = vector.broadcast %9 : vector<8x1xf32> to vector<8x8xf32>
    %11 = arith.subf %7, %10 : vector<8x8xf32>
    %12 = math.exp %11 : vector<8x8xf32>
    %cst_6 = arith.constant dense<0.000000e+00> : vector<8xf32>
    %13 = vector.multi_reduction <add>, %12, %cst_6 [1] : vector<8x8xf32> to vector<8xf32>
    %14 = vector.shape_cast %13 : vector<8xf32> to vector<8x1xf32>
    %15 = tpu.reciprocal %14 {approx = true} : vector<8x1xf32> -> vector<8x1xf32>
    %16 = arith.mulf %14, %15 : vector<8x1xf32>
    %cst_7 = arith.constant 2.000000e+00 : f32
    %17 = vector.broadcast %cst_7 : f32 to vector<8x1xf32>
    %18 = arith.subf %17, %16 : vector<8x1xf32>
    %19 = arith.mulf %15, %18 : vector<8x1xf32>
    %20 = vector.broadcast %19 : vector<8x1xf32> to vector<8x8xf32>
    %21 = arith.mulf %12, %20 : vector<8x8xf32>
    %22 = math.exp %21 : vector<8x8xf32>
    %cst_8 = arith.constant dense<0.000000e+00> : vector<8xf32>
    %23 = vector.multi_reduction <add>, %22, %cst_8 [1] : vector<8x8xf32> to vector<8xf32>
    %24 = vector.shape_cast %23 : vector<8xf32> to vector<8x1xf32>
    %25 = math.log %24 : vector<8x1xf32>
    %26 = tpu.iota {dimensions = array<i32: 0>} : vector<8x8xi32>
    %c8_i32 = arith.constant 8 : i32
    %27 = arith.muli %arg0, %c8_i32 : i32
    %28 = vector.broadcast %27 : i32 to vector<8x8xi32>
    %29 = arith.addi %26, %28 : vector<8x8xi32>
    %30 = tpu.iota {dimensions = array<i32: 1>} : vector<8x8xi32>
    %31 = arith.cmpi eq, %29, %30 : vector<8x8xi32>
    %cst_9 = arith.constant 0.000000e+00 : f32
    %32 = vector.broadcast %cst_9 : f32 to vector<8x8xf32>
    %33 = arith.select %31, %21, %32 : vector<8x8xi1>, vector<8x8xf32>
    %cst_10 = arith.constant dense<0.000000e+00> : vector<8xf32>
    %34 = vector.multi_reduction <add>, %33, %cst_10 [1] : vector<8x8xf32> to vector<8xf32>
    %35 = vector.shape_cast %34 : vector<8xf32> to vector<8x1xf32>
    %c0_11 = arith.constant 0 : index
    %c0_12 = arith.constant 0 : index
    %36 = vector.load %arg3[%c0_11, %c0_12] : memref<1x1xf32, #tpu.memory_space<vmem>>, vector<1x1xf32>
    %37 = arith.subf %25, %35 : vector<8x1xf32>
    %38 = vector.shape_cast %37 : vector<8x1xf32> to vector<1x8x1xf32>
    %cst_13 = arith.constant dense<0.000000e+00> : vector<1xf32>
    %39 = vector.multi_reduction <add>, %38, %cst_13 [1, 2] : vector<1x8x1xf32> to vector<1xf32>
    %40 = vector.shape_cast %39 : vector<1xf32> to vector<1x1x1xf32>
    %41 = vector.extract %40[0, 0, 0] : f32 from vector<1x1x1xf32>
    %42 = vector.broadcast %41 : f32 to vector<1x1xf32>
    %43 = arith.addf %36, %42 : vector<1x1xf32>
    %c0_14 = arith.constant 0 : index
    %c0_15 = arith.constant 0 : index
    %44 = vector.load %arg3[%c0_14, %c0_15] : memref<1x1xf32, #tpu.memory_space<vmem>>, vector<1x1xf32>
    tpu.vector_store %arg3[%c0_14, %c0_15], %43 {strides = array<i32>} : memref<1x1xf32, #tpu.memory_space<vmem>>, vector<1x1xf32>,
    return
  }
  func.func @transform_0(%arg0: i32) -> (i32, i32) {
    %c0_i32 = arith.constant 0 : i32
    %c0_i32_0 = arith.constant 0 : i32
    return %arg0, %c0_i32 : i32, i32
  }
  func.func @transform_1(%arg0: i32) -> (i32, i32) {
    %c0_i32 = arith.constant 0 : i32
    %c0_i32_0 = arith.constant 0 : i32
    %c0_i32_1 = arith.constant 0 : i32
    return %c0_i32, %c0_i32_0 : i32, i32
  }
  func.func @transform_2(%arg0: i32) -> (i32, i32) {
    %c0_i32 = arith.constant 0 : i32
    %c0_i32_0 = arith.constant 0 : i32
    %c0_i32_1 = arith.constant 0 : i32
    return %c0_i32, %c0_i32_0 : i32, i32
  }
}

</mosaic_0001>

<bundles_post_ra>
// kernel: tpu_custom_call.1
= control target key start
LH: loop header
LB: loop body
LE: loop exit
PB: predicated region body
PF: predicated region fallthrough
CT: control target
= control target key end

     0   :  { %7 = vsyncpa [#allocation3], 0  ;;  %s314_s0 = inlined_call_operand.hbm [shape: f32[8,32], index: 0, kind: input, shape index: {}]   ;;  %s315_s1 = inlined_call_operand.hbm [shape: f32[8,32], index: 1, kind: input, shape index: {}]   ;;  %s316_s2 = inlined_call_operand.hbm [shape: f32[1,1], index: 2, kind: output, shape index: {}]  }
   0x1   :  { %8 = vsyncpa [#allocation6], 0 }
   0x2   :  { %9 = vsyncpa [#allocation4], 0  ;;  %s279_s9 = smov [#allocation2]   ;;  %s280_s11 = smov [#allocation5]  }
   0x3   :  { %s16_s10 = sshll.u32 %s279_s9, 4  ;;  %s26_s12 = sshll.u32 %s280_s11, 4  ;;  %s17_s10 = int_to_ptr.vmem [resolvable:$true] %s16_s10  ;;  %s27_s12 = int_to_ptr.vmem [resolvable:$true] %s26_s12 }
   0x4   :  { %s221_s13 = scalar_lea.vmem %s17_s10, 128  ;;  %p226_p1 = scmp.lt.s32.totalorder %s17_s10, %s17_s10 }
   0x5   :  { %p222_p0 = scmp.ne.s32.totalorder %s17_s10, %s221_s13  ;;  %p227_p2 = scmp.lt.s32.totalorder %s221_s13, %s221_s13 }
   0x7   :  { %p228_p3 = por %p227_p2, %p226_p1 }
   0x9   :  { %p229_p4 = pnand %p228_p3, %p222_p0 }
   0xb   :  { %232 = shalt.err (!%p229_p4)
}
   0xc   :  { %19 = dma.hbm_to_vmem [thread:$0]  %s314_s0, 128, %s17_s10, [#allocation3]  }
   0xd   :  { %s241_s16 = scalar_lea.vmem %s27_s12, 128  ;;  %p246_p6 = scmp.lt.s32.totalorder %s27_s12, %s27_s12 }
   0xe   :  { %p242_p5 = scmp.ne.s32.totalorder %s27_s12, %s241_s16  ;;  %p247_p7 = scmp.lt.s32.totalorder %s241_s16, %s241_s16 }
  0x10   :  { %p248_p8 = por %p247_p7, %p246_p6 }
  0x12   :  { %p249_p9 = pnand %p248_p8, %p242_p5 }
  0x14   :  { %252 = shalt.err (!%p249_p9)
}
  0x15   :  { %29 = dma.hbm_to_vmem [thread:$0]  %s315_s1, 128, %s27_s12, [#allocation6]  }
  0x16   :  { %273 = dma.done.wait [#allocation3], 128  }
  0x17   :  { %274 = vsyncadd [#allocation3], 4294967168 }
  0x18   :  { %275 = dma.done.wait [#allocation6], 128  }
  0x19   :  { %276 = vsyncadd [#allocation6], 4294967168  ;;  %vm40_vm0 = vcmask 0   ;;  %v281_v0 = vmov 0.0   ;;  %vm282_vm1 = vmmov 0   ;;  %vm45_vm2 = vcmask 261120  }
  0x1a   :  { %41 = vst.msk [vmem:[#allocation7] sm:$0x1] %vm40_vm0, %v281_v0  ;;  %193 = vmatprep.subr.mxu0 %v281_v0  ;;  %195 = vmatprep.mubr.msk.f32.mxu0 %vm282_vm1, %v281_v0  ;;  %v44_v1 = vld [vmem:[#allocation5] sm:$0xff]  ;;  %v42_v2 = vld [vmem:[#allocation2] sm:$0xff]  ;;  %vm122_vm3 = vcmask 64512   ;;  %v144_v19 = vlaneseq  ;;  %vm158_vm5 = vcmask 7168  }
  0x1b   :  { %194 = vmatpush3.xpose.msk.msra.mxu0 %vm45_vm2, %v44_v1  ;;  %v43_v3 = vmul.f32 1000000.0, %v42_v2  ;;  %s283_s0 = smov [#allocation7]  }
  0x1c   :  { %v145_v20 = vshrl.u32 %v144_v19, 7  ;;  %v150_v21 = vand.u32 127, %v144_v19  ;;  %s179_s1 = sshll.u32 %s283_s0, 4  ;;  %s180_s1 = int_to_ptr.vmem [resolvable:$true] %s179_s1 }
  0x1d   :  { %s253_s20 = scalar_lea.vmem %s180_s1, 16  ;;  %s257_s21 = scalar_lea.vmem %s180_s1, 32 }
  0x1e   :  { %196 = vmatmul.mubr.msk.f32.vlgmr.msra.gmra.mxu0 %vm45_vm2, %v43_v3  ;;  %vm151_vm4 = vcmp.eq.s32.totalorder %v145_v20, %v150_v21  ;;  %p254_p10 = scmp.ne.s32.totalorder %s180_s1, %s253_s20  ;;  %p258_p11 = scmp.lt.s32.totalorder %s180_s1, %s180_s1 }
  0x1f   :  { %p259_p12 = scmp.lt.s32.totalorder %s257_s21, %s253_s20 }
  0x21   :  { %v156_v39 = vld [vmem:[#allocation7] sm:$0x1]  ;;  %p260_p13 = por %p259_p12, %p258_p11 }
  0x23   :  { %p261_p0 = pnand %p260_p13, %p254_p10 }
  0xde   :  { %v118_v4 = vpop.f32.mrf.mxu0 }
  0xdf   :  { %v123_v5 = vsel %vm122_vm3, %v118_v4, -inf }
  0xe0   :  { %124 = vmax.xlane.f32.xlu0 %v123_v5  ;;  %v197_v6 = vpop.f32.mrf.mxu0 }
 0x169   :  { %v125_v7 = vpop.xlane.xlu0 %124 }
 0x16a   :  { %v126_v8 = vsub.f32 %v118_v4, %v125_v7 }
 0x16c   :  { %v127_v9 = vmul.f32 1.442695, %v126_v8 }
 0x16e   :  { %205 = vpow2.f32 %v127_v9 }
 0x17b   :  { %v206_v10 = vpop.eup %205 }
 0x17c   :  { %v129_v11 = vsel %vm122_vm3, %v206_v10, 0.0 }
 0x17d   :  { %130 = vadd.xlane.f32.xlu0 %v129_v11 }
 0x206   :  { %v131_v12 = vpop.xlane.xlu0 %130 }
 0x207   :  { %207 = vrcp.f32 %v131_v12 }
 0x214   :  { %v208_v13 = vpop.eup %207 }
 0x215   :  { %v133_v14 = vmul.f32 %v208_v13, %v131_v12 }
 0x217   :  { %v134_v15 = vsub.f32 2.0, %v133_v14 }
 0x219   :  { %v135_v16 = vmul.f32 %v208_v13, %v134_v15 }
 0x21b   :  { %v136_v17 = vmul.f32 %v206_v10, %v135_v16 }
 0x21d   :  { %v137_v18 = vmul.f32 1.442695, %v136_v17  ;;  %v152_v24 = vsel %vm151_vm4, %v136_v17, 0.0 }
 0x21e   :  { %v153_v25 = vsel %vm122_vm3, %v152_v24, 0.0 }
 0x21f   :  { %209 = vpow2.f32 %v137_v18 }
 0x22c   :  { %v210_v22 = vpop.eup %209 }
 0x22d   :  { %v139_v23 = vsel %vm122_vm3, %v210_v22, 0.0 }
 0x22e   :  { %140 = vadd.xlane.f32.xlu1 %v139_v23 }
 0x232   :  { %154 = vadd.xlane.f32.xlu1 %v153_v25 }
 0x2b7   :  { %v141_v26 = vpop.xlane.xlu1 %140 }
 0x2b8   :  { %211 = vlog2.f32 %v141_v26 }
 0x2bb   :  { %v155_v29 = vpop.xlane.xlu1 %154 }
 0x2c5   :  { %v212_v27 = vpop.eup %211 }
 0x2c6   :  { %v143_v28 = vmul.f32 0.6931472, %v212_v27 }
 0x2c8   :  { %v157_v30 = vsub.f32 %v143_v28, %v155_v29 }
 0x2ca   :  { %v159_v31 = vsel %vm158_vm5, %v157_v30, 0.0 }
 0x2cb   :  { %160 = vadd.xlane.f32.xlu0 %v159_v31 }
 0x354   :  { %v161_v32 = vpop.xlane.xlu0 %160 }
 0x355   :  { %v162_v33 = vrot.slane %v161_v32, 4 }
 0x357   :  { %v163_v34 = vadd.f32 %v162_v33, %v161_v32 }
 0x359   :  { %v164_v35 = vrot.slane %v163_v34, 2 }
 0x35b   :  { %v165_v36 = vadd.f32 %v164_v35, %v163_v34 }
 0x35d   :  { %v166_v37 = vrot.slane %v165_v36, 1 }
 0x35f   :  { %v167_v38 = vadd.f32 %v166_v37, %v165_v36 }
 0x361   :  { %198 = vpush %v167_v38 }
 0x392   :  { %s199_s19 = spop %198 }
 0x393   :  { %v169_v40 = vstv %s199_s19 }
 0x394   :  { %v170_v41 = vadd.f32 %v169_v40, %v156_v39 }
 0x396   :  { %172 = vst.msk [vmem:[#allocation7] sm:$0x1] %vm40_vm0, %v170_v41 }
 0x397   :  { %264 = shalt.err (!%p261_p0)
}
 0x398   :  { %182 = dma.vmem_to_hbm [thread:$0]  %s180_s1, 16, %s316_s2, [#allocation4]  }
 0x399   :  { %277 = dma.done.wait [#allocation4], 16  }
 0x39a   :  { %278 = vsyncadd [#allocation4], 4294967280 }
 0x39b   :  { %186 = vsyncpa [#allocation3], 1 }
 0x39c   :  { %187 = vsyncpa [#allocation6], 1 }
 0x39d   :  { %188 = vsyncpa [#allocation4], 1 }

</bundles_post_ra>
